<compile_context>
chip_gen: v6e
topology: v6e:2x2x1
jax: 0.10.0
libtpu: 0.0.40
codegen_flags: <defaults>
</compile_context>

<pallas_src>
import jax
import jax.numpy as jnp
from jax.experimental import pallas as pl
from jax.experimental.pallas import tpu as pltpu


def make_pos_emb(input_size: int, max_block_size: int) -> jnp.ndarray:
    """Build the (1, max_block_size, input_size) sinusoidal table (plain-JAX glue)."""
    pos = jnp.arange(max_block_size, dtype=jnp.float32)[:, None]                # (L, 1)
    denom = jnp.power(
        10000.0,
        2.0 * (jnp.arange(0, input_size, 2, dtype=jnp.float32) / input_size),  # (D/2,)
    )
    angles = pos / denom                                                        # (L, D/2)
    pe = jnp.zeros((max_block_size, input_size), dtype=jnp.float32)
    pe = pe.at[:, 0::2].set(jnp.sin(angles))
    pe = pe.at[:, 1::2].set(jnp.cos(angles))
    return pe[None, :, :]                                                       # (1, L, D)


def _pe_kernel(keep_ref, pos_ref, out_ref):
    """out = keep * pos, one (TILE_B, TILE_T, D) output tile per grid step.

    keep_ref: (TILE_B, TILE_T, 1) float32   (1.0 = real token, 0.0 = padding)
    pos_ref : (TILE_T, D)         float32   (resident across the inner batch axis)
    out_ref : (TILE_B, TILE_T, D) float32
    """
    out_ref[...] = keep_ref[...] * pos_ref[...][None, :, :]


def _vmem_cap_bytes() -> int:
    """Per-core VMEM capacity (v5e/v6e: 128 MiB, v7x: 64 MiB); conservative fallback."""
    try:
        info = pltpu.get_tpu_info()
        cap = getattr(info, "vmem_capacity_bytes", None)
        if cap:
            return int(cap)
    except Exception:
        pass
    return 64 << 20


def positional_embedding_forward(pos_emb: jnp.ndarray,
                                 x: jnp.ndarray,
                                 word_mask: jnp.ndarray,
                                 *,
                                 tile_t: int | None = None,
                                 tile_b: int | None = None,
                                 use_pallas: bool | None = None) -> jnp.ndarray:
    """Pallas implementation of PositionalEmbedding.forward(x, word_mask)."""
    B, T = word_mask.shape
    L, D = pos_emb.shape[1], pos_emb.shape[-1]
    assert x.shape[1] == T, "x and word_mask sequence lengths must match"
    if T > L:
        raise ValueError(f"sequence length T={T} exceeds max_block_size={L}")

    # --- wrapper glue (tiny, XLA-fused): lane-trivial f32 keep factor + table slice ---
    keep = (1.0 - word_mask.astype(jnp.float32))[:, :, None]     # (B, T, 1)
    pos = pos_emb[0, :T, :].astype(jnp.float32)                  # (T, D)

    # --- tiny-output fast path: a fused XLA broadcast beats any kernel launch --------
    out_bytes = B * T * D * 4
    if use_pallas is None:
        use_pallas = out_bytes >= (1 << 20)
    if not use_pallas:
        return keep * pos[None, :, :]

    # --- tile sizing (~4 MiB output tiles; fold batch in for short sequences) --------
    target_bytes = 4 << 20
    row_bytes = D * 4
    if T >= 8:
        t_cap = (T // 8) * 8                                     # largest aligned tile <= T
        if tile_t is None:
            tile_t = max(8, min(((target_bytes // row_bytes) // 8) * 8, t_cap))
        else:
            tile_t = max(8, min((tile_t // 8) * 8, t_cap))
    else:
        tile_t = T                                               # full-extent block (T < 8)
    n_t = pl.cdiv(T, tile_t)

    if tile_b is None:
        tile_b = 1
        if n_t == 1:                                             # short seq: fold batch in
            tile_b = max(1, min(B, target_bytes // max(tile_t * row_bytes, 1)))
    tile_b = max(1, min(tile_b, B))
    n_b = pl.cdiv(B, tile_b)

    # Keep >=2 grid steps when possible so both v7x TensorCores get work.
    if n_t * n_b == 1:
        if B > 1:
            tile_b = (B + 1) // 2
            n_b = pl.cdiv(B, tile_b)
        elif T >= 16:
            tile_t = max(8, ((pl.cdiv(T, 2) + 7) // 8) * 8)
            n_t = pl.cdiv(T, tile_t)

    grid = (n_t, n_b)                                            # batch innermost: pos tile resident

    # --- VMEM budget (double-buffered tiles + headroom, <=75% of physical VMEM) ------
    out_tile_bytes = tile_b * tile_t * D * 4
    pos_tile_bytes = tile_t * max(D, 128) * 4
    keep_tile_bytes = tile_b * max(tile_t, 8) * 128 * 4          # last dim 1 lane-pads to 128
    need = 2 * (out_tile_bytes + pos_tile_bytes + keep_tile_bytes) + (8 << 20)
    vmem_limit = int(min(max(need, 32 << 20), _vmem_cap_bytes() * 3 // 4))

    return pl.pallas_call(
        _pe_kernel,
        out_shape=jax.ShapeDtypeStruct((B, T, D), jnp.float32),
        grid=grid,
        in_specs=[
            pl.BlockSpec((tile_b, tile_t, 1), lambda j, b: (b, j, 0)),   # keep
            pl.BlockSpec((tile_t, D), lambda j, b: (j, 0)),              # pos table tile
        ],
        out_specs=pl.BlockSpec((tile_b, tile_t, D), lambda j, b: (b, j, 0)),
        compiler_params=pltpu.CompilerParams(
            dimension_semantics=("parallel", "parallel"),
            vmem_limit_bytes=vmem_limit,
        ),
    )(keep, pos)


if __name__ == "__main__":
    # Small, deterministic example (lane-dense D; T=200 exercises a partial boundary tile).
    B, T, D = 2, 200, 128
    MAX_BLOCK_SIZE = 256

    key = jax.random.PRNGKey(0)
    kx, km = jax.random.split(key)

    x = jax.random.normal(kx, (B, T, D), dtype=jnp.float32)      # only x.shape[1] is used
    word_mask = jax.random.bernoulli(km, p=0.3, shape=(B, T))    # bool, True = padding

    pos_emb = make_pos_emb(D, MAX_BLOCK_SIZE)                    # buffer from __init__

    # Pure-JAX reference (mirrors the PyTorch forward exactly).
    ref = (~word_mask).astype(jnp.float32)[:, :, None] * pos_emb[:, :T, :]

    # Multi-T-tile Pallas path: 4 T-tiles x 2 batch steps; last T-tile's OOB stores dropped.
    out = positional_embedding_forward(pos_emb, x, word_mask, tile_t=64, use_pallas=True)
    out = jax.block_until_ready(out)
    assert out.shape == (B, T, D) and out.dtype == jnp.float32
    assert jnp.allclose(out, ref, atol=1e-6, rtol=1e-6), "mismatch vs reference (tiled)"

    # Auto-tile Pallas path: single T tile, batch split into 2 grid steps (megacore-friendly).
    out2 = positional_embedding_forward(pos_emb, x, word_mask, use_pallas=True)
    out2 = jax.block_until_ready(out2)
    assert jnp.allclose(out2, ref, atol=1e-6, rtol=1e-6), "mismatch vs reference (auto tile)"

    # Tiny-output default path bypasses pallas_call (fused XLA broadcast multiply).
    out3 = positional_embedding_forward(pos_emb, x, word_mask)
    out3 = jax.block_until_ready(out3)
    assert jnp.allclose(out3, ref, atol=1e-6, rtol=1e-6), "mismatch vs reference (xla path)"

    print("KERNEL_OK")
</pallas_src>

<mosaic_0001>
module attributes {stable_mosaic.version = 11 : i64} {
  func.func @_pe_kernel(%arg0: i32, %arg1: i32, %arg2: memref<1x64x1xf32, #tpu.memory_space<vmem>>, %arg3: memref<64x128xf32, #tpu.memory_space<vmem>>, %arg4: memref<1x64x128xf32, #tpu.memory_space<vmem>>) attributes {dimension_semantics = [#tpu.dimension_semantics<parallel>, #tpu.dimension_semantics<parallel>], iteration_bounds = array<i64: 4, 2>, scalar_prefetch = 0 : i64, scratch_operands = 0 : i64, tpu.core_type = #tpu.core_type<tc>, window_params = [{transform_indices = @transform_0, window_bounds = array<i64: 1, 64, 1>}, {transform_indices = @transform_1, window_bounds = array<i64: 64, 128>}, {transform_indices = @transform_2, window_bounds = array<i64: 1, 64, 128>}]} {
    %c0 = arith.constant 0 : index
    %c0_0 = arith.constant 0 : index
    %c0_1 = arith.constant 0 : index
    %0 = vector.load %arg2[%c0, %c0_0, %c0_1] : memref<1x64x1xf32, #tpu.memory_space<vmem>>, vector<1x64x1xf32>
    %c0_2 = arith.constant 0 : index
    %c0_3 = arith.constant 0 : index
    %1 = vector.load %arg3[%c0_2, %c0_3] : memref<64x128xf32, #tpu.memory_space<vmem>>, vector<64x128xf32>
    %2 = vector.shape_cast %1 : vector<64x128xf32> to vector<1x64x128xf32>
    %3 = vector.broadcast %0 : vector<1x64x1xf32> to vector<1x64x128xf32>
    %4 = arith.mulf %3, %2 : vector<1x64x128xf32>
    %c0_4 = arith.constant 0 : index
    %c0_5 = arith.constant 0 : index
    %c0_6 = arith.constant 0 : index
    %5 = vector.load %arg4[%c0_4, %c0_5, %c0_6] : memref<1x64x128xf32, #tpu.memory_space<vmem>>, vector<1x64x128xf32>
    tpu.vector_store %arg4[%c0_4, %c0_5, %c0_6], %4 {strides = array<i32>} : memref<1x64x128xf32, #tpu.memory_space<vmem>>, vector<1x64x128xf32>,
    return
  }
  func.func @transform_0(%arg0: i32, %arg1: i32) -> (i32, i32, i32) {
    %c0_i32 = arith.constant 0 : i32
    %c0_i32_0 = arith.constant 0 : i32
    return %arg1, %arg0, %c0_i32 : i32, i32, i32
  }
  func.func @transform_1(%arg0: i32, %arg1: i32) -> (i32, i32) {
    %c0_i32 = arith.constant 0 : i32
    %c0_i32_0 = arith.constant 0 : i32
    return %arg0, %c0_i32 : i32, i32
  }
  func.func @transform_2(%arg0: i32, %arg1: i32) -> (i32, i32, i32) {
    %c0_i32 = arith.constant 0 : i32
    %c0_i32_0 = arith.constant 0 : i32
    return %arg1, %arg0, %c0_i32 : i32, i32, i32
  }
}

</mosaic_0001>

<bundles_post_ra>
// kernel: tpu_custom_call.1
= control target key start
LH: loop header
LB: loop body
LE: loop exit
PB: predicated region body
PF: predicated region fallthrough
CT: control target
= control target key end

     0   :  { %7 = vsyncpa [#allocation3], 0  ;;  %s804_s0 = inlined_call_operand.vmem [shape: f32[2,200,1], index: 0, kind: input, shape index: {}]   ;;  %s805_s1 = inlined_call_operand.vmem [shape: f32[200,128], index: 1, kind: input, shape index: {}]   ;;  %s806_s2 = inlined_call_operand.hbm [shape: f32[2,200,128], index: 2, kind: output, shape index: {}]  }
   0x1   :  { %9 = vsyncpa [#allocation3 + $0x1], 0  ;;  %s636_s9 = smov 0   ;;  %s638_s10 = smov 0  }
   0x2   :  { %s640_s11 = smov 0   ;;  %s642_s12 = smov 0  }
   0x3   :  { %s644_s13 = smov 0   ;;  %s646_s14 = smov 0  }
   0x4   :  { %s648_s15 = smov 0   ;;  %s650_s16 = smov 0  }
   0x5 LB: > { %s427_s17 = sadd.s32 4294967295, %s615_s16   ;;  %s428_s18 = sadd.s32 4294967294, %s615_s16   ;;  %s615_s16 = sphi %s650_s16, %s15_s16   ;;  %s611_s15 = sphi %s648_s15, %s815_s15   ;;  %s607_s14 = sphi %s646_s14, %s814_s14   ;;  %s603_s13 = sphi %s644_s13, %s813_s13   ;;  %s599_s12 = sphi %s642_s12, %s812_s12   ;;  %s595_s11 = sphi %s640_s11, %s811_s11   ;;  %s591_s10 = sphi %s638_s10, %s810_s10   ;;  %s587_s9 = sphi %s636_s9, %s809_s9  }
   0x6   : > { %s24_s19 = sadd.s32 1, %s607_s14  ;;  %s27_s20 = sadd.s32 1, %s611_s15 }
   0x7   : > { %p25_p0 = scmp.ge.s32.totalorder %s24_s19, 2  ;;  %p100_p1 = scmp.ne.s32.totalorder %s595_s11, %s591_s10 }
   0x8   : > { %p101_p2 = scmp.eq.s32.totalorder %s427_s17, 7  ;;  %p106_p5 = scmp.ne.s32.totalorder %s591_s10, %s587_s9 }
   0x9   : > { %s817_s19 = smov (%p25_p0, %s24_s19), 0  ;;  %s819_s20 = smov (!%p25_p0, %s27_s20), %s611_s15 }
   0xa   : > { %s85_s21 = ssub.s32 %s607_s14, %s817_s19  ;;  %p685_p3 = por %p101_p2, %p100_p1 }
   0xb   : > { %p29_p4 = scmp.ge.s32.totalorder %s819_s20, 4  ;;  %p107_p6 = scmp.eq.s32.totalorder %s428_s18, 7 }
   0xc   : > { %p431_p7 = scmp.ge.s32.totalorder %s615_s16, 1  ;;  %p163_p9 = scmp.lt.s32.totalorder %s615_s16, 9 }
   0xd   : > { %s821_s20 = smov (%p29_p4, %s819_s20), 0  ;;  %p694_p8 = por %p107_p6, %p106_p5 }
   0xe   : > { %s86_s24 = ssub.s32 %s611_s15, %s821_s20  ;;  %s90_s25 = sadd.s32 1, %s595_s11 }
   0xf   : > { %s87_s26 = sor.u32 %s86_s24, %s85_s21  ;;  %p164_p10 = pnand %p431_p7, %p163_p9 }
  0x10   : > { %p88_p11 = scmp.eq.s32.totalorder %s87_s26, 0  ;;  %s705_s28 = sshll.u32 (!%p164_p10), %s603_s13, 3 }
  0x11   : > { %167 = sbr.rel (%p164_p10) target bundleno = 197 (0xc5), region = 28  ;;  %p207_p12 = scmp.lt.s32.totalorder (!%p164_p10), %s599_s12, 1 }
  0x12   : > { %s703_s27 = scalar_select %p88_p11, %s595_s11, %s90_s25  }
  0x13   : > { %p209_p13 = scmp.lt.s32.totalorder (!%p164_p10), %s705_s28, 24  ;;  %s199_s13 = sand.u32 (!%p164_p10), 1, %s591_s10  }
  0x14   : > { %s432_s25 = sshll.u32 (!%p164_p10), %s199_s13, 6 }
  0x15   : > { %s720_s26 = scalar_lea.vmem (!%p164_p10), [#allocation2], %s432_s25 }
  0x16   : > { %v617_v0 = vmov 0   ;;  %s208_s29 = scalar_select %p207_p12, %s599_s12, 1 }
  0x17   : > { %522 = vset.pattern.permute.xlu1 %v617_v0  ;;  %521 = vset.pattern.permute.xlu0 %v617_v0  ;;  %s210_s30 = scalar_select %p209_p13, %s705_s28, 24 }
  0x18   : > { %s446_s3 = smul.u32 25, %s208_s29  ;;  %s732_s29 = scalar_lea.sflag [#allocation3], %s199_s13 }
  0x19   : > { %s436_s17 = sshll.u32 %s210_s30, 3 }
  0x1a   : > { %s212_s4 = sadd.s32 %s446_s3, %s210_s30  ;;  %s228_s24 = scalar_lea.vmem %s805_s1, %s436_s17 }
  0x1b   : > { %s434_s5 = sshll.u32 %s212_s4, 3  ;;  %v249_v9 = vld [vmem:[%s228_s24 + $0x10] sm:$0xff]  ;;  %v247_v10 = vld [vmem:[%s228_s24] sm:$0xff]  ;;  %v250_v15 = vld [vmem:[%s228_s24 + $0x18] sm:$0xff]  ;;  %s320_s30 = ssub.s32 (%p685_p3), 25, %s705_s28 }
  0x1c   : > { %s214_s8 = scalar_lea.vmem %s804_s0, %s434_s5  ;;  %v248_v16 = vld [vmem:[%s228_s24 + $0x8] sm:$0xff]  ;;  %v251_v22 = vld [vmem:[%s228_s24 + $0x20] sm:$0xff]  ;;  %v254_v27 = vld [vmem:[%s228_s24 + $0x38] sm:$0xff]  ;;  %p321_p0 = scmp.lt.s32.totalorder (%p685_p3), %s320_s30, 8 }
  0x1d   : > { %v241_v1 = vld [vmem:[%s214_s8 + $0x10] sm:$0xff]  ;;  %v239_v2 = vld [vmem:[%s214_s8] sm:$0xff]  ;;  %v242_v3 = vld [vmem:[%s214_s8 + $0x18] sm:$0xff] }
  0x1e   : > { %267 = vperm.xlu1 %522, %v241_v1   ;;  %257 = vperm.xlu0 %521, %v239_v2   ;;  %v240_v4 = vld [vmem:[%s214_s8 + $0x8] sm:$0xff]  ;;  %v243_v6 = vld [vmem:[%s214_s8 + $0x20] sm:$0xff]  ;;  %v246_v7 = vld [vmem:[%s214_s8 + $0x38] sm:$0xff] }
  0x1f   : > { %v244_v5 = vld [vmem:[%s214_s8 + $0x28] sm:$0xff]  ;;  %v245_v8 = vld [vmem:[%s214_s8 + $0x30] sm:$0xff] }
  0x20   : > { %v252_v21 = vld [vmem:[%s228_s24 + $0x28] sm:$0xff]  ;;  %v253_v28 = vld [vmem:[%s228_s24 + $0x30] sm:$0xff] }
  0x22   : > { %272 = vperm.xlu1 %522, %v242_v3   ;;  %262 = vperm.xlu0 %521, %v240_v4  }
  0x26   : > { %282 = vperm.xlu1 %522, %v244_v5   ;;  %277 = vperm.xlu0 %521, %v243_v6  }
  0x2a   : > { %292 = vperm.xlu1 %522, %v246_v7   ;;  %287 = vperm.xlu0 %521, %v245_v8  }
  0x99   : > { %v268_v11 = vpop.permute.xlu1 %267  ;;  %v258_v12 = vpop.permute.xlu0 %257 }
  0x9a   : > { %v297_v13 = vmul.f32 %v268_v11, %v249_v9  ;;  %v295_v14 = vmul.f32 %v258_v12, %v247_v10 }
  0x9c   : > { %305 = vst [vmem:[%s720_s26 + $0x10] sm:$0xff] %v297_v13  ;;  %303 = vst [vmem:[%s720_s26] sm:$0xff] %v295_v14 }
  0x9d   : > { %v273_v17 = vpop.permute.xlu1 %272  ;;  %v263_v18 = vpop.permute.xlu0 %262 }
  0x9e   : > { %v298_v19 = vmul.f32 %v273_v17, %v250_v15  ;;  %v296_v20 = vmul.f32 %v263_v18, %v248_v16 }
  0xa0   : > { %306 = vst [vmem:[%s720_s26 + $0x18] sm:$0xff] %v298_v19  ;;  %304 = vst [vmem:[%s720_s26 + $0x8] sm:$0xff] %v296_v20 }
  0xa1   : > { %v283_v23 = vpop.permute.xlu1 %282  ;;  %v278_v24 = vpop.permute.xlu0 %277 }
  0xa2   : > { %v300_v25 = vmul.f32 %v283_v23, %v252_v21  ;;  %v299_v26 = vmul.f32 %v278_v24, %v251_v22 }
  0xa4   : > { %308 = vst [vmem:[%s720_s26 + $0x28] sm:$0xff] %v300_v25  ;;  %307 = vst [vmem:[%s720_s26 + $0x20] sm:$0xff] %v299_v26  ;;  %318 = sbr.rel (!%p685_p3) target bundleno = 197 (0xc5), region = 32 }
  0xa5   : > { %v293_v29 = vpop.permute.xlu1 %292  ;;  %v288_v30 = vpop.permute.xlu0 %287 }
  0xa6   : > { %v302_v31 = vmul.f32 %v293_v29, %v254_v27  ;;  %v301_v32 = vmul.f32 %v288_v30, %v253_v28 }
  0xa8   : > { %310 = vst [vmem:[%s720_s26 + $0x38] sm:$0xff] %v302_v31  ;;  %309 = vst [vmem:[%s720_s26 + $0x30] sm:$0xff] %v301_v32 }
  0xa9   : > { %s823_s30 = smov (!%p321_p0, %s320_s30), 8 }
  0xaa   : > { %s737_s3 = sshll.u32 %s823_s30, 7 }
  0xab   : > { %s325_s4 = ssub.s32 1024, %s737_s3 }
  0xac   : > { %326 = vsyncadd %s732_s29, %s325_s4  ;;  %p440_p1 = scmp.ne.s32.totalorder %s737_s3, 0  ;;  %s447_s5 = smul.u32 25, %s599_s12 }
  0xad   : > { %s333_s22 = sshll.u32 %s720_s26, 4  ;;  %s618_s21 = smov [#allocation2]   ;;  %s745_s22 = int_to_ptr.vmem [resolvable:$true] %s333_s22 }
  0xae   : > { %s329_s6 = sadd.s32 %s447_s5, %s705_s28  ;;  %s523_s18 = scalar_lea.vmem %s745_s22, %s737_s3 }
  0xaf   : > { %s441_s7 = sshll.u32 %s329_s6, 7  ;;  %p524_p2 = scmp.ne.s32.totalorder %s745_s22, %s523_s18 }
  0xb0   : > { %s750_s17 = scalar_lea.hbm %s806_s2, %s441_s7  ;;  %s527_s12 = sshll.u32 %s618_s21, 4  ;;  %s528_s12 = int_to_ptr.vmem [resolvable:$false] %s527_s12 }
  0xb1   : > { %p525_p3 = pnand %p524_p2, %p440_p1  ;;  %s529_s28 = scalar_lea.vmem %s528_s12, 2048 }
  0xb2   : > { %p530_p5 = scmp.lt.s32.totalorder %s745_s22, %s528_s12  ;;  %p531_p6 = scmp.lt.s32.totalorder %s529_s28, %s523_s18 }
  0xb3   : > { %p526_p4 = pneg %p525_p3 }
  0xb4   : > { %p532_p7 = por %p531_p6, %p530_p5 }
  0xb6   : > { %p533_p9 = pnand %p532_p7, %p526_p4 }
  0xb8   : > { %536 = shalt.err (!%p533_p9)
}
  0xb9   : > { %s537_s24 = scalar_lea.hbm %s750_s17, %s737_s3  ;;  %s541_s30 = scalar_lea.hbm %s806_s2, 6400 }
  0xba   : > { %p538_p10 = scmp.ne.s32.totalorder %s750_s17, %s537_s24  ;;  %p542_p13 = scmp.lt.s32.totalorder %s750_s17, %s806_s2 }
  0xbb   : > { %p543_p0 = scmp.lt.s32.totalorder %s541_s30, %s537_s24 }
  0xbc   : > { %p539_p11 = pnand %p538_p10, %p440_p1 }
  0xbd   : > { %p544_p2 = por %p543_p0, %p542_p13 }
  0xbe   : > { %p540_p12 = pneg %p539_p11 }
  0xc0   : > { %p545_p3 = pnand %p544_p2, %p540_p12 }
  0xc2   : > { %548 = shalt.err (!%p545_p3)
}
  0xc3   : > { %s619_s6 = smov 128   ;;  %s620_s7 = smov 8  }
  0xc4   : > { %339 = dma.vmem_to_hbm [thread:$0]  (%p440_p1), %s745_s22, %s737_s3, %s750_s17, %s732_s29, %s619_s6, %s619_s6, %s620_s7  }
  0xc5 PF: > { %p453_p4 = scmp.ge.s32.totalorder %s615_s16, 2  ;;  %s348_s8 = sand.u32 1, %s587_s9  }
  0xc6   : > { %s349_s13 = scalar_lea.sflag [#allocation3], %s348_s8 }
  0xc7   : > { %p450_p5 = pnand %p453_p4, %p694_p8 }
  0xc9   : > { %p451_p6 = pneg %p450_p5 }
  0xcb   : > { %582 = dma.done.wait (%p451_p6), %s349_s13, 1024  }
  0xcc   : > { %584 = vsyncadd (%p451_p6), %s349_s13, 4294966272  ;;  %s15_s16 = sadd.s32 1, %s615_s16   ;;  %s809_s9 = smov %s591_s10 }
  0xcd   : > { %p12_p7 = scmp.ge.s32.totalorder %s15_s16, 10   ;;  %s810_s10 = smov %s595_s11 }
  0xce   : > { %s811_s11 = smov %s703_s27  ;;  %s812_s12 = smov %s607_s14 }
  0xcf   : > { %s813_s13 = smov %s611_s15  ;;  %s814_s14 = smov %s817_s19 }
  0xd0   : > { %s815_s15 = smov %s821_s20  ;;  %14 = sbr.rel (!%p12_p7) target bundleno = 5 (0x5), region = 66 }
  0xd5   :  { %354 = vsyncpa [#allocation3], 1 }
  0xd6   :  { %356 = vsyncpa [#allocation3 + $0x1], 1 }

</bundles_post_ra>
